<compile_context>
chip_gen: v6e
topology: v6e:2x2x1
jax: 0.10.0
libtpu: 0.0.40
codegen_flags: <defaults>
</compile_context>

<pallas_src>
import functools

import jax
import jax.numpy as jnp
import numpy as np
from jax.experimental import pallas as pl
from jax.experimental.pallas import tpu as pltpu

EPS = 1e-5  # PyTorch InstanceNorm3d default eps (affine=False)


# ---------------------------------------------------------------------------
# Fused kernel: one grid step == one sample.
# ---------------------------------------------------------------------------
def _res_block_kernel(x_ref, w1_ref, w2_ref, mask_ref, out_ref, *,
                      lane_shifts, inv_rows):
    # x_ref:    (1, Cp, Rpad) f32 -- spatially padded volume, channels-first, flattened
    #                                spatial on lanes (zero pad ring + zero lane tail).
    # w*_ref:   (27, Cp, Cp)  f32 -- per-tap (out_ch, in_ch) conv matrices, tap-major.
    # mask_ref: (1, Rpad)     f32 -- 1.0 at interior voxels of the padded flat grid.
    # out_ref:  (1, Cp, Rpad) f32
    x = x_ref[0]
    mask = mask_ref[...]

    def conv3x3x3(src, w_ref):
        # src already carries the zero pad ring (== F.pad(., 1)).  Cyclic-roll wrap
        # garbage only reaches ring / lane-tail outputs, which are masked or sliced off.
        acc = None
        for t, shift in enumerate(lane_shifts):
            tap = src if shift == 0 else pltpu.roll(src, shift, axis=1)        # XLU
            part = jnp.dot(w_ref[t], tap, preferred_element_type=jnp.float32)  # MXU
            acc = part if acc is None else acc + part
        return acc

    def instance_norm(acc):
        # Masked stats over interior voxels only; E[x^2]-E[x]^2 saves a full-slab pass.
        am = acc * mask
        mean = jnp.sum(am, axis=1, keepdims=True) * inv_rows
        var = jnp.sum(am * am, axis=1, keepdims=True) * inv_rows - mean * mean
        scale = jax.lax.rsqrt(jnp.maximum(var, 0.0) + EPS)                     # EUP
        return (acc - mean) * scale

    # conv1 (+bias dropped: cancels under InstanceNorm) -> norm -> ReLU; the mask
    # re-zeroes the pad ring so y1 is already "F.pad-ed" for conv2.
    y1 = jnp.maximum(instance_norm(conv3x3x3(x, w1_ref)), 0.0) * mask
    # conv2 -> norm (intermediate never leaves VMEM), then residual add.
    y2 = instance_norm(conv3x3x3(y1, w2_ref))
    out_ref[0] = (x + y2).astype(out_ref.dtype)  # ring/tail garbage is sliced away


# ---------------------------------------------------------------------------
# Probe the device roll convention once (guards against a silent orientation flip).
# ---------------------------------------------------------------------------
@functools.lru_cache(maxsize=None)
def _roll_matches_numpy():
    def k(x_ref, o_ref):
        o_ref[...] = pltpu.roll(x_ref[...], 1, axis=1)

    x = jnp.arange(8 * 128, dtype=jnp.float32).reshape(8, 128)
    y = pl.pallas_call(k, out_shape=jax.ShapeDtypeStruct((8, 128), jnp.float32))(x)
    return bool(np.asarray(y)[0, 0] == 127.0)  # np.roll: row 0 becomes [127, 0, 1, ...]


# ---------------------------------------------------------------------------
# Shape-specialized builder (cached): returns a jitted (x, w1, w2) -> NCDHW callable.
# ---------------------------------------------------------------------------
@functools.lru_cache(maxsize=None)
def _make_residual_block(n, c, d, h, w, roll_is_numpy):
    cp = ((c + 7) // 8) * 8                    # channel pad for aligned sublane layout
    dp, hp, wp = d + 2, h + 2, w + 2
    rp = dp * hp * wp                          # flattened padded spatial size
    rpad = ((rp + 127) // 128) * 128           # 128-aligned lane extent
    rows = d * h * w                           # interior voxels per (n, c) instance

    # Flat shift of each 3x3x3 tap in the padded grid; to read src[p + s] the slab is
    # rolled by -s (np.roll convention) or +s (opposite convention).
    spatial = [od * hp * wp + oh * wp + ow
               for od in (-1, 0, 1) for oh in (-1, 0, 1) for ow in (-1, 0, 1)]
    sgn = -1 if roll_is_numpy else 1
    lane_shifts = tuple(int((sgn * s) % rpad) for s in spatial)

    kernel = functools.partial(_res_block_kernel,
                               lane_shifts=lane_shifts, inv_rows=1.0 / rows)

    # Interior-voxel mask over the padded + lane-padded flat grid: (1, Rpad).
    mask_np = np.zeros((dp, hp, wp), np.float32)
    mask_np[1:-1, 1:-1, 1:-1] = 1.0
    mask = jnp.asarray(np.pad(mask_np.reshape(1, rp), ((0, 0), (0, rpad - rp))))

    flops = 4 * n * rpad * (27 * cp) * cp      # two convs, 27 (Cp,Cp)@(Cp,Rpad) each
    bytes_accessed = 2 * 4 * n * cp * rpad + 2 * 4 * 27 * cp * cp + 4 * rpad

    pallas_fn = pl.pallas_call(
        kernel,
        out_shape=jax.ShapeDtypeStruct((n, cp, rpad), jnp.float32),
        grid=(n,),
        in_specs=[
            pl.BlockSpec((1, cp, rpad), lambda i: (i, 0, 0)),
            pl.BlockSpec((27, cp, cp), lambda i: (0, 0, 0)),
            pl.BlockSpec((27, cp, cp), lambda i: (0, 0, 0)),
            pl.BlockSpec((1, rpad), lambda i: (0, 0)),
        ],
        out_specs=pl.BlockSpec((1, cp, rpad), lambda i: (i, 0, 0)),
        compiler_params=pltpu.CompilerParams(
            dimension_semantics=("parallel",),
            # Whole-sample slabs are ~32 KB each here; 32 MiB leaves ample headroom and
            # still respects v7x's 64 MiB physical VMEM when row-tiling lands.
            vmem_limit_bytes=32 * 1024 * 1024),
        cost_estimate=pl.CostEstimate(flops=flops, transcendentals=2 * n * cp,
                                      bytes_accessed=bytes_accessed),
    )

    @jax.jit
    def run(x, w1, w2):
        # Channel pad + spatial pad ring + flatten + 128-align lanes (one XLA fusion).
        xs = jnp.pad(x, ((0, 0), (0, cp - c), (1, 1), (1, 1), (1, 1))).reshape(n, cp, rp)
        xs = jnp.pad(xs, ((0, 0), (0, 0), (0, rpad - rp)))

        # Torch OIDHW weights -> (27, Cp, Cp) f32, tap-major (kd, kh, kw) order.
        def to_mat(wt):
            wt = jnp.pad(wt, ((0, cp - c), (0, cp - c), (0, 0), (0, 0), (0, 0)))
            return jnp.transpose(wt, (2, 3, 4, 0, 1)).reshape(27, cp, cp)

        out = pallas_fn(xs, to_mat(w1), to_mat(w2), mask)
        # TODO(synk): an interior-only output layout written by the kernel would remove
        # this extra activation-sized HBM pass (and the one building xs above).
        out = out[:, :c, :rp].reshape(n, c, dp, hp, wp)
        return out[:, :, 1:-1, 1:-1, 1:-1]

    return run


def residual_block(x, w1, b1, w2, b2):
    # b1/b2 accepted for API parity with nn.Conv3d but mathematically dead: a per-channel
    # bias is removed exactly by the following InstanceNorm(affine=False) mean subtract.
    del b1, b2
    n, c, d, h, w = x.shape
    return _make_residual_block(n, c, d, h, w, _roll_matches_numpy())(x, w1, w2)


# ---------------------------------------------------------------------------
# Pure-JAX reference (uses the biases; the kernel drops them -> proves exact cancellation).
# ---------------------------------------------------------------------------
def _reference(x, w1, b1, w2, b2):
    def conv(z, wt, bv):
        zp = jnp.pad(z, ((0, 0), (0, 0), (1, 1), (1, 1), (1, 1)))
        y = jax.lax.conv_general_dilated(
            zp, wt, window_strides=(1, 1, 1), padding="VALID",
            dimension_numbers=("NCDHW", "OIDHW", "NCDHW"),
            precision=jax.lax.Precision.HIGHEST)
        return y + bv.reshape(1, -1, 1, 1, 1)

    def inorm(y):
        mean = y.mean(axis=(2, 3, 4), keepdims=True)
        var = ((y - mean) ** 2).mean(axis=(2, 3, 4), keepdims=True)
        return (y - mean) * jax.lax.rsqrt(var + EPS)

    hid = jnp.maximum(inorm(conv(x, w1, b1)), 0.0)
    return x + inorm(conv(hid, w2, b2))


if __name__ == "__main__":
    N, C, D, H, W = 2, 4, 8, 8, 8
    key = jax.random.PRNGKey(0)
    kx, kw1, kb1, kw2, kb2 = jax.random.split(key, 5)

    x = jax.random.normal(kx, (N, C, D, H, W), jnp.float32)

    # Deterministic params mimicking PyTorch Conv3d default init (fan_in = C*27).
    fan_in = C * 27
    bound = 1.0 / np.sqrt(fan_in)
    w1 = jax.random.uniform(kw1, (C, C, 3, 3, 3), jnp.float32, -bound, bound)
    b1 = jax.random.uniform(kb1, (C,), jnp.float32, -bound, bound)
    w2 = jax.random.uniform(kw2, (C, C, 3, 3, 3), jnp.float32, -bound, bound)
    b2 = jax.random.uniform(kb2, (C,), jnp.float32, -bound, bound)

    out = residual_block(x, w1, b1, w2, b2)
    jax.block_until_ready(out)

    ref = _reference(x, w1, b1, w2, b2)
    # Operands now stay f32 end-to-end; tolerance kept loose in case the default matmul
    # precision on a given generation rounds through bf16 internally.
    np.testing.assert_allclose(np.asarray(out), np.asarray(ref), atol=5e-2, rtol=5e-2)

    print("KERNEL_OK")
</pallas_src>

<mosaic_0001>
module attributes {stable_mosaic.version = 11 : i64} {
  func.func @k(%arg0: memref<8x128xf32, #tpu.memory_space<vmem>>, %arg1: memref<8x128xf32, #tpu.memory_space<vmem>>) attributes {dimension_semantics = [], scalar_prefetch = 0 : i64, scratch_operands = 0 : i64, tpu.core_type = #tpu.core_type<tc>} {
    %c0 = arith.constant 0 : index
    %c0_0 = arith.constant 0 : index
    %0 = vector.load %arg0[%c0, %c0_0] : memref<8x128xf32, #tpu.memory_space<vmem>>, vector<8x128xf32>
    %c1_i32 = arith.constant 1 : i32
    %1 = tpu.dynamic_rotate %0 by %c1_i32 dim 1 : vector<8x128xf32>, i32 -> vector<8x128xf32>
    %c0_1 = arith.constant 0 : index
    %c0_2 = arith.constant 0 : index
    %2 = vector.load %arg1[%c0_1, %c0_2] : memref<8x128xf32, #tpu.memory_space<vmem>>, vector<8x128xf32>
    tpu.vector_store %arg1[%c0_1, %c0_2], %1 {strides = array<i32>} : memref<8x128xf32, #tpu.memory_space<vmem>>, vector<8x128xf32>,
    return
  }
}

</mosaic_0001>

<bundles_post_ra>
// kernel: tpu_custom_call.1
= control target key start
LH: loop header
LB: loop body
LE: loop exit
PB: predicated region body
PF: predicated region fallthrough
CT: control target
= control target key end

     0   :  { %6 = vsyncpa [#allocation3], 0  ;;  %s106_s0 = inlined_call_operand.hbm [shape: f32[8,128], index: 0, kind: input, shape index: {}]   ;;  %s107_s1 = inlined_call_operand.hbm [shape: f32[8,128], index: 1, kind: output, shape index: {}]  }
   0x1   :  { %7 = vsyncpa [#allocation4], 0  ;;  %s87_s6 = smov [#allocation2]  }
   0x2   :  { %s14_s7 = sshll.u32 %s87_s6, 4  ;;  %s15_s7 = int_to_ptr.vmem [resolvable:$true] %s14_s7 }
   0x3   :  { %s51_s8 = scalar_lea.vmem %s15_s7, 128  ;;  %p56_p1 = scmp.lt.s32.totalorder %s15_s7, %s15_s7 }
   0x4   :  { %p52_p0 = scmp.ne.s32.totalorder %s15_s7, %s51_s8  ;;  %p57_p2 = scmp.lt.s32.totalorder %s51_s8, %s51_s8 }
   0x6   :  { %p58_p3 = por %p57_p2, %p56_p1 }
   0x8   :  { %p59_p4 = pnand %p58_p3, %p52_p0 }
   0xa   :  { %62 = shalt.err (!%p59_p4)
}
   0xb   :  { %17 = dma.hbm_to_vmem [thread:$0]  %s106_s0, 128, %s15_s7, [#allocation3]  }
   0xc   :  { %83 = dma.done.wait [#allocation3], 128  }
   0xd   :  { %84 = vsyncadd [#allocation3], 4294967168  ;;  %v21_v0 = vld [vmem:[#allocation2] sm:$0xff]  ;;  %s88_s11 = smov 1   ;;  %s89_s12 = smov [#allocation5]  }
   0xe   :  { %22 = vrot.lane.b32.xlu0 %v21_v0, %s88_s11  ;;  %s31_s13 = sshll.u32 %s89_s12, 4  ;;  %s32_s13 = int_to_ptr.vmem [resolvable:$true] %s31_s13 }
   0xf   :  { %s63_s14 = scalar_lea.vmem %s32_s13, 128  ;;  %p68_p6 = scmp.lt.s32.totalorder %s32_s13, %s32_s13 }
  0x10   :  { %p64_p5 = scmp.ne.s32.totalorder %s32_s13, %s63_s14  ;;  %p69_p7 = scmp.lt.s32.totalorder %s63_s14, %s63_s14 }
  0x12   :  { %p70_p8 = por %p69_p7, %p68_p6 }
  0x14   :  { %p71_p9 = pnand %p70_p8, %p64_p5 }
  0x80   :  { %v23_v1 = vpop.permute.xlu0 %22 }
  0x81   :  { %24 = vst [vmem:[#allocation5] sm:$0xff] %v23_v1 }
  0x82   :  { %74 = shalt.err (!%p71_p9)
}
  0x83   :  { %34 = dma.vmem_to_hbm [thread:$0]  %s32_s13, 128, %s107_s1, [#allocation4]  }
  0x84   :  { %85 = dma.done.wait [#allocation4], 128  }
  0x85   :  { %86 = vsyncadd [#allocation4], 4294967168 }
  0x86   :  { %38 = vsyncpa [#allocation3], 1 }
  0x87   :  { %39 = vsyncpa [#allocation4], 1 }

</bundles_post_ra>
